<compile_context>
chip_gen: v5e
topology: v5e:2x2
jax: 0.10.0
libtpu: 0.0.40
codegen_flags: <defaults>
</compile_context>

<pallas_src>
import functools

import jax
import jax.numpy as jnp
from jax.experimental import pallas as pl
from jax.experimental.pallas import tpu as pltpu


def _round_up(x, m):
    return ((x + m - 1) // m) * m


def _dropconnect_train_kernel(x_ref, w_ref, b_ref, bw_ref, bb_ref, o_ref,
                              *, threshold_i32, compute_dtype):
    """x:(TB,K) compute_dtype, w:(K,Np) f32, b:(1,Np) f32, bits i32 -> o:(TB,Np)."""
    # DropConnect: keep each param element with prob (1 - p), no rescale.
    # bits are uniform int32, so P(bits < threshold_i32) = 1 - p.
    keep_w = bw_ref[...] < threshold_i32          # (K, Np)
    keep_b = bb_ref[...] < threshold_i32          # (1, Np)
    w = jnp.where(keep_w, w_ref[...], 0.0)        # mask in f32 (VPU, v5e-safe)
    b = jnp.where(keep_b, b_ref[...], 0.0)        # (1, Np) f32
    y = jnp.dot(x_ref[...], w.astype(compute_dtype),
                preferred_element_type=jnp.float32) + b
    o_ref[...] = y.astype(o_ref.dtype)


def _dropconnect_eval_kernel(x_ref, w_ref, b_ref, o_ref, *, compute_dtype):
    y = jnp.dot(x_ref[...], w_ref[...].astype(compute_dtype),
                preferred_element_type=jnp.float32) + b_ref[...]
    o_ref[...] = y.astype(o_ref.dtype)


def dropconnect_linear(x, w, b, key, *, p=0.1, training=True,
                       block_b=4096, compute_dtype=jnp.bfloat16):
    """DropConnect-wrapped linear.

    x: (B, K), w: (N, K) (PyTorch nn.Linear layout), b: (N,),
    key: jax PRNG key (vary per step!).  Returns (B, N) in x.dtype.
    """
    B, K = x.shape
    N, K2 = w.shape
    assert K == K2 and b.shape == (N,)
    out_dtype = x.dtype

    # Lane-dense output: pad N up to a multiple of 128 so result stores are
    # full-width vst's and MXU columns are fully used (padding cols are zero).
    Np = max(128, _round_up(N, 128))

    # One-time layout work outside the hot path:
    #   (N, K) -> (K, Np) pre-transposed + zero column padding, bias -> (1, Np).
    w_kn = jnp.zeros((K, Np), jnp.float32).at[:, :N].set(w.T.astype(jnp.float32))
    b2 = jnp.zeros((1, Np), jnp.float32).at[:, :N].set(b.astype(jnp.float32))

    # x is the dominant HBM stream at large B -> cast once in the wrapper.
    x_c = x.astype(compute_dtype)

    # Batch tiling: params resident, x / out streamed.  Tile as large as
    # sensible, multiple of 16 (bf16 sublane tile), and >=2 grid steps when
    # the batch is big enough so v7x megacore can split it.
    tb = min(block_b, B)
    if B >= 32:
        tb = min(tb, _round_up(pl.cdiv(B, 2), 16))
        tb = _round_up(tb, 16)
    grid = (pl.cdiv(B, tb),)

    apply_mask = bool(training) and float(p) > 0.0
    if apply_mask:
        keep = 1.0 - float(p)
        # Saturation at 2^32-1 biases keep-prob by ~2^-32 for p -> 0: negligible.
        t_unsigned = max(0, min(int(round(keep * 2 ** 32)), 2 ** 32 - 1))
        threshold_i32 = t_unsigned - 2 ** 31       # static signed threshold
        kw_key, kb_key = jax.random.split(key)
        bits_w = jax.lax.bitcast_convert_type(
            jax.random.bits(kw_key, (K, Np), dtype=jnp.uint32), jnp.int32)
        bits_b = jax.lax.bitcast_convert_type(
            jax.random.bits(kb_key, (1, Np), dtype=jnp.uint32), jnp.int32)

        kernel = functools.partial(_dropconnect_train_kernel,
                                   threshold_i32=threshold_i32,
                                   compute_dtype=compute_dtype)
        in_specs = [
            pl.BlockSpec((tb, K), lambda i: (i, 0)),     # x: streamed over batch
            pl.BlockSpec((K, Np), lambda i: (0, 0)),     # weight: resident
            pl.BlockSpec((1, Np), lambda i: (0, 0)),     # bias: resident
            pl.BlockSpec((K, Np), lambda i: (0, 0)),     # weight mask bits
            pl.BlockSpec((1, Np), lambda i: (0, 0)),     # bias mask bits
        ]
        operands = (x_c, w_kn, b2, bits_w, bits_b)
    else:
        kernel = functools.partial(_dropconnect_eval_kernel,
                                   compute_dtype=compute_dtype)
        in_specs = [
            pl.BlockSpec((tb, K), lambda i: (i, 0)),
            pl.BlockSpec((K, Np), lambda i: (0, 0)),
            pl.BlockSpec((1, Np), lambda i: (0, 0)),
        ]
        operands = (x_c, w_kn, b2)

    out_padded = pl.pallas_call(
        kernel,
        out_shape=jax.ShapeDtypeStruct((B, Np), out_dtype),
        grid=grid,
        in_specs=in_specs,
        out_specs=pl.BlockSpec((tb, Np), lambda i: (i, 0)),
        compiler_params=pltpu.CompilerParams(
            dimension_semantics=("parallel",)),          # megacore on v7x
    )(*operands)
    return out_padded[:, :N]


if __name__ == "__main__":
    B, K, N = 2, 32, 32
    p = 0.1

    root = jax.random.PRNGKey(0)
    kx, kw, kb, kmask = jax.random.split(root, 4)

    # Deterministic nn.Linear-style init: U(-1/sqrt(K), 1/sqrt(K)).
    bound = 1.0 / (K ** 0.5)
    x = jax.random.normal(kx, (B, K), dtype=jnp.float32)
    w = jax.random.uniform(kw, (N, K), minval=-bound, maxval=bound, dtype=jnp.float32)
    b = jax.random.uniform(kb, (N,), minval=-bound, maxval=bound, dtype=jnp.float32)

    # Reference uses the same bf16 casts as the kernel's compute path.
    def _bf16(a):
        return a.astype(jnp.bfloat16).astype(jnp.float32)

    # Eval mode: plain linear through the kernel; check against pure JAX.
    y_eval = dropconnect_linear(x, w, b, kmask, p=p, training=False)
    jax.block_until_ready(y_eval)
    y_eval_ref = _bf16(x) @ _bf16(w.T) + b
    assert jnp.allclose(y_eval, y_eval_ref, atol=1e-2, rtol=1e-2), "eval-mode mismatch"

    # Training mode: DropConnect-masked linear.  The mask bits are reproducible
    # outside the kernel, so the masked result can be checked directly.
    y_train = dropconnect_linear(x, w, b, kmask, p=p, training=True)
    jax.block_until_ready(y_train)

    Np = max(128, _round_up(N, 128))
    thr = max(0, min(int(round((1.0 - p) * 2 ** 32)), 2 ** 32 - 1)) - 2 ** 31
    kw_key, kb_key = jax.random.split(kmask)
    bits_w_ref = jax.lax.bitcast_convert_type(
        jax.random.bits(kw_key, (K, Np), dtype=jnp.uint32), jnp.int32)
    bits_b_ref = jax.lax.bitcast_convert_type(
        jax.random.bits(kb_key, (1, Np), dtype=jnp.uint32), jnp.int32)
    w_keep = (bits_w_ref[:, :N] < thr).astype(jnp.float32)   # (K, N)
    b_keep = (bits_b_ref[0, :N] < thr).astype(jnp.float32)   # (N,)
    y_train_ref = _bf16(x) @ _bf16(w.T * w_keep) + b * b_keep
    assert jnp.allclose(y_train, y_train_ref, atol=1e-2, rtol=1e-2), "train-mode mismatch"

    assert y_train.shape == (B, N) and y_train.dtype == jnp.float32
    print("KERNEL_OK")
</pallas_src>

<mosaic_0001>
module attributes {stable_mosaic.version = 11 : i64} {
  func.func @_dropconnect_eval_kernel(%arg0: i32, %arg1: memref<2x32xbf16, #tpu.memory_space<vmem>>, %arg2: memref<32x128xf32, #tpu.memory_space<vmem>>, %arg3: memref<1x128xf32, #tpu.memory_space<vmem>>, %arg4: memref<2x128xf32, #tpu.memory_space<vmem>>) attributes {dimension_semantics = [#tpu.dimension_semantics<parallel>], iteration_bounds = array<i64: 1>, scalar_prefetch = 0 : i64, scratch_operands = 0 : i64, tpu.core_type = #tpu.core_type<tc>, window_params = [{transform_indices = @transform_0, window_bounds = array<i64: 2, 32>}, {pipeline_mode = #tpu.pipeline_mode<synchronous>, transform_indices = @transform_1, window_bounds = array<i64: 32, 128>}, {pipeline_mode = #tpu.pipeline_mode<synchronous>, transform_indices = @transform_2, window_bounds = array<i64: 1, 128>}, {transform_indices = @transform_3, window_bounds = array<i64: 2, 128>}]} {
    %c0 = arith.constant 0 : index
    %c0_0 = arith.constant 0 : index
    %0 = vector.load %arg1[%c0, %c0_0] : memref<2x32xbf16, #tpu.memory_space<vmem>>, vector<2x32xbf16>
    %c0_1 = arith.constant 0 : index
    %c0_2 = arith.constant 0 : index
    %1 = vector.load %arg2[%c0_1, %c0_2] : memref<32x128xf32, #tpu.memory_space<vmem>>, vector<32x128xf32>
    %2 = arith.truncf %1 : vector<32x128xf32> to vector<32x128xbf16>
    %cst = arith.constant dense<0.000000e+00> : vector<2x128xf32>
    %3 = tpu.matmul %0, %2, %cst {dimension_numbers = #tpu.dot_dimension_numbers<[1], [0], [0], [1], [0, 0, 1, 1], [], []>} : vector<2x32xbf16>, vector<32x128xbf16>, vector<2x128xf32> -> vector<2x128xf32>
    %c0_3 = arith.constant 0 : index
    %c0_4 = arith.constant 0 : index
    %4 = vector.load %arg3[%c0_3, %c0_4] : memref<1x128xf32, #tpu.memory_space<vmem>>, vector<1x128xf32>
    %5 = vector.broadcast %4 : vector<1x128xf32> to vector<2x128xf32>
    %6 = arith.addf %3, %5 : vector<2x128xf32>
    %c0_5 = arith.constant 0 : index
    %c0_6 = arith.constant 0 : index
    %7 = vector.load %arg4[%c0_5, %c0_6] : memref<2x128xf32, #tpu.memory_space<vmem>>, vector<2x128xf32>
    tpu.vector_store %arg4[%c0_5, %c0_6], %6 {strides = array<i32>} : memref<2x128xf32, #tpu.memory_space<vmem>>, vector<2x128xf32>,
    return
  }
  func.func @transform_0(%arg0: i32) -> (i32, i32) {
    %c0_i32 = arith.constant 0 : i32
    %c0_i32_0 = arith.constant 0 : i32
    return %arg0, %c0_i32 : i32, i32
  }
  func.func @transform_1(%arg0: i32) -> (i32, i32) {
    %c0_i32 = arith.constant 0 : i32
    %c0_i32_0 = arith.constant 0 : i32
    %c0_i32_1 = arith.constant 0 : i32
    return %c0_i32, %c0_i32_0 : i32, i32
  }
  func.func @transform_2(%arg0: i32) -> (i32, i32) {
    %c0_i32 = arith.constant 0 : i32
    %c0_i32_0 = arith.constant 0 : i32
    %c0_i32_1 = arith.constant 0 : i32
    return %c0_i32, %c0_i32_0 : i32, i32
  }
  func.func @transform_3(%arg0: i32) -> (i32, i32) {
    %c0_i32 = arith.constant 0 : i32
    %c0_i32_0 = arith.constant 0 : i32
    return %arg0, %c0_i32 : i32, i32
  }
}

</mosaic_0001>

<bundles_post_ra>
// kernel: tpu_custom_call.1
= control target key start
LH: loop header
LB: loop body
LE: loop exit
PB: predicated region body
PF: predicated region fallthrough
CT: control target
= control target key end

     0   :  { %8 = vsyncpa [#allocation3], 0  ;;  %s215_s0 = inlined_call_operand.hbm [shape: bf16[2,32], index: 0, kind: input, shape index: {}]   ;;  %s216_s1 = inlined_call_operand.hbm [shape: f32[32,128], index: 1, kind: input, shape index: {}]   ;;  %s217_s2 = inlined_call_operand.vmem [shape: f32[1,128], index: 2, kind: input, shape index: {}]   ;;  %s218_s3 = inlined_call_operand.hbm [shape: f32[2,128], index: 3, kind: output, shape index: {}]  }
   0x1   :  { %9 = vsyncpa [#allocation6], 0 }
   0x2   :  { %10 = vsyncpa [#allocation4], 0  ;;  %s16_s14 = sshll.u32 %s215_s0, 4  ;;  %s178_s15 = smov [#allocation2]   ;;  %s17_s14 = int_to_ptr.hbm [resolvable:$true] %s16_s14 }
   0x3   :  { %s18_s16 = sshll.u32 %s178_s15, 4  ;;  %s26_s19 = sshll.u32 %s216_s1, 4  ;;  %s19_s16 = int_to_ptr.vmem [resolvable:$true] %s18_s16  ;;  %s27_s19 = int_to_ptr.hbm [resolvable:$true] %s26_s19 }
   0x4   :  { %21 = dma.hbm_to_vmem [thread:$0]  %s17_s14, 16, %s19_s16, [#allocation3]  }
   0x5   :  { %s179_s20 = smov [#allocation5]   ;;  %s180_s22 = smov 128  }
   0x6   :  { %s28_s21 = sshll.u32 %s179_s20, 4  ;;  %s181_s23 = smov 8   ;;  %s29_s21 = int_to_ptr.vmem [resolvable:$true] %s28_s21 }
   0x7   :  { %34 = dma.hbm_to_vmem [thread:$0]  %s27_s19, 512, %s29_s21, [#allocation6], %s180_s22, %s180_s22, %s181_s23  }
   0x8   :  { %172 = dma.done.wait [#allocation3], 16  }
   0x9   :  { %173 = vsyncadd [#allocation3], 4294967280 }
   0xa   :  { %174 = dma.done.wait [#allocation6], 512  }
   0xb   :  { %175 = vsyncadd [#allocation6], 4294966784  ;;  %v49_v0 = vld [vmem:[#allocation5 + $0x10] sm:$0xff]  ;;  %v50_v1 = vld [vmem:[#allocation5 + $0x18] sm:$0xff]  ;;  %vm57_vm0 = vcmask 261120   ;;  %s182_s24 = smov [#allocation7]  }
   0xc   :  { %v47_v2 = vld [vmem:[#allocation5] sm:$0xff]  ;;  %v52_v3 = vpack.c.bf16 %v50_v1, %v49_v0  ;;  %v48_v4 = vld [vmem:[#allocation5 + $0x8] sm:$0xff]  ;;  %v46_v6 = vld [vmem:[#allocation2] sm:$0x1]  ;;  %s80_s25 = sshll.u32 %s182_s24, 4  ;;  %s82_s28 = sshll.u32 %s218_s3, 4  ;;  %s81_s25 = int_to_ptr.vmem [resolvable:$true] %s80_s25  ;;  %s83_s28 = int_to_ptr.hbm [resolvable:$true] %s82_s28 }
   0xd   :  { %v51_v5 = vpack.c.bf16 %v48_v4, %v47_v2  ;;  %v99_v7 = vld [vmem:[%s217_s2] ss:$0 sm:$0xff] }
   0xe   :  { %67 = vmatpush.bf16.msra.mxu0 %v52_v3 }
  0x12   :  { %68 = vmatpush.bf16.msra.mxu0 %v51_v5 }
  0x15   :  { %93 = vmatmul.msk.bf16.vlgmr.msra.gmra.mxu0 %vm57_vm0, %v46_v6 }
  0x92   :  { %v70_v8 = vpop.f32.mrf.mxu0 }
  0x93   :  { %v71_v9 = vadd.f32 %v99_v7, %v70_v8 }
  0x95   :  { %74 = vst [vmem:[#allocation7] sm:$0x3] %v71_v9 }
  0x96   :  { %85 = dma.vmem_to_hbm [thread:$0]  %s81_s25, 32, %s83_s28, [#allocation4]  }
  0x9a   :  { %v72_v10 = vpop.f32.mrf.mxu0 }
  0x9b   :  { %176 = dma.done.wait [#allocation4], 32  }
  0x9c   :  { %177 = vsyncadd [#allocation4], 4294967264 }
  0x9d   :  { %90 = vsyncpa [#allocation3], 1 }
  0x9e   :  { %91 = vsyncpa [#allocation6], 1 }
  0x9f   :  { %92 = vsyncpa [#allocation4], 1 }

</bundles_post_ra>
